<compile_context>
chip_gen: v7x
topology: tpu7x:2x2x1
jax: 0.10.0
libtpu: 0.0.40
codegen_flags: <defaults>
</compile_context>

<pallas_src>
import math

import jax
import jax.numpy as jnp
from jax.experimental import pallas as pl
from jax.experimental.pallas import tpu as pltpu


def _to_2tuple(x):
    if isinstance(x, (tuple, list)):
        return tuple(x)
    return (x, x)


def _pick_tm(M):
    """M-tile size: large MXU-aligned tiles for big M, one full tile for small M."""
    if M >= 1024:
        return 512   # multiple of 256 (v6e/v7x MXU) and 128 (v5e); grid >= 2
    if M >= 512:
        return 256   # keeps >= 2 tiles so the parallel axis covers both v7x TCs
    return M         # single full-extent tile (full array dim is always a legal block dim)


# ---------------------------------------------------------------------------
# Pallas kernel: tiled im2col matmul + bias (the conv hot path)
# ---------------------------------------------------------------------------
def _patch_embed_kernel(p_ref, w_ref, b_ref, o_ref):
    # p_ref: (tm, K) bf16 patch tile (streamed over the M grid)
    # w_ref: (K, E)  bf16 weight, VMEM-resident across the grid
    # b_ref: (1, E)  f32 bias,    VMEM-resident across the grid
    # o_ref: (tm, E) output tile
    acc = jnp.dot(p_ref[...], w_ref[...], preferred_element_type=jnp.float32)
    o_ref[...] = (acc + b_ref[...]).astype(o_ref.dtype)


def _patch_embed_matmul(patches, w_k, bias, *, out_dtype=jnp.float32):
    """(M, K) @ (K, E) + (1, E), tiled over M with a parallel grid."""
    M, K = patches.shape
    _, E = w_k.shape
    tm = _pick_tm(M)
    # Per-step VMEM (bf16 patch tile + out tile, double-buffered, plus the
    # resident (K, E) weight) is <10 MiB even at tm=512, E=768 -- well inside
    # the default scoped-VMEM limit on v5e/v6e (128 MiB) and v7x (64 MiB), so
    # no explicit vmem_limit_bytes is needed at these tile sizes.
    return pl.pallas_call(
        _patch_embed_kernel,
        out_shape=jax.ShapeDtypeStruct((M, E), out_dtype),
        grid=(pl.cdiv(M, tm),),
        in_specs=[
            pl.BlockSpec((tm, K), lambda i: (i, 0)),   # streamed patch tiles
            pl.BlockSpec((K, E), lambda i: (0, 0)),    # weight stays resident
            pl.BlockSpec((1, E), lambda i: (0, 0)),    # bias stays resident
        ],
        out_specs=pl.BlockSpec((tm, E), lambda i: (i, 0)),
        compiler_params=pltpu.CompilerParams(
            # Independent M tiles -> shardable across both TensorCores on v7x.
            dimension_semantics=("parallel",)),
    )(patches, w_k, bias)


# ---------------------------------------------------------------------------
# Module equivalent
# ---------------------------------------------------------------------------
class PatchEmbedOverlap:
    """JAX/Pallas equivalent of PatchEmbed_overlap."""

    def __init__(self, img_size=224, patch_size=16, stride_size=20,
                 in_chans=3, embed_dim=768, key=None, out_dtype=jnp.float32):
        img_size = _to_2tuple(img_size)
        patch_size = _to_2tuple(patch_size)
        stride = _to_2tuple(stride_size)
        self.num_x = (img_size[1] - patch_size[1]) // stride[1] + 1
        self.num_y = (img_size[0] - patch_size[0]) // stride[0] + 1
        self.num_patches = self.num_x * self.num_y
        self.img_size = img_size
        self.patch_size = patch_size
        self.stride = stride
        self.in_chans = in_chans
        self.embed_dim = embed_dim
        self.out_dtype = out_dtype

        if key is None:
            key = jax.random.PRNGKey(0)
        kw, kb = jax.random.split(key)
        # PyTorch init: weight ~ N(0, sqrt(2 / (kh*kw*out_channels)))
        n = patch_size[0] * patch_size[1] * embed_dim
        std = math.sqrt(2.0 / n)
        # weight layout matches torch Conv2d: (out_channels, in_chans, kh, kw)
        self.weight = std * jax.random.normal(
            kw, (embed_dim, in_chans, patch_size[0], patch_size[1]),
            dtype=jnp.float32)
        # Conv2d default bias init: U(-1/sqrt(fan_in), 1/sqrt(fan_in))
        fan_in = in_chans * patch_size[0] * patch_size[1]
        bound = 1.0 / math.sqrt(fan_in)
        self.bias = jax.random.uniform(
            kb, (embed_dim,), minval=-bound, maxval=bound, dtype=jnp.float32)

        # Pre-reshape/transpose the conv weight once (weights are static per
        # step): (K, E) in bf16 for the MXU.  Bias kept f32 for the f32 epilogue.
        # (If K is not a multiple of 128 the kernel's lane dim is masked; a
        #  static K-pad of weight+patches would make it lane-dense at the cost
        #  of extra patch bytes -- not worth it for this memory-bound op.)
        K = in_chans * patch_size[0] * patch_size[1]
        self.w_k = jnp.transpose(
            self.weight.reshape(embed_dim, K)).astype(jnp.bfloat16)   # (K, E)
        self.bias2d = self.bias.reshape(1, embed_dim).astype(jnp.float32)

    def __call__(self, x):
        B, C, H, W = x.shape
        assert H == self.img_size[0] and W == self.img_size[1], (
            f"Input image size ({H}*{W}) doesn't match model "
            f"({self.img_size[0]}*{self.img_size[1]}).")
        ph, pw = self.patch_size
        sh, sw = self.stride
        Kdim = C * ph * pw

        # bf16 *before* im2col: the patch extraction is a pure gather, so this
        # is bit-identical to casting afterwards but halves the bytes of the
        # largest HBM intermediate.
        xb = x.astype(jnp.bfloat16)

        # --- glue: im2col in a single XLA op (identity-kernel grouped conv).
        # NHWC output spec puts K last, ordered (C, ph, pw) -- exactly the
        # flattened torch Conv2d weight order -- so the reshape below is a free
        # contiguous collapse (no transpose pass).
        patches = jax.lax.conv_general_dilated_patches(
            xb, filter_shape=(ph, pw), window_strides=(sh, sw),
            padding="VALID",
            dimension_numbers=("NCHW", "OIHW", "NHWC"))
        # (B, num_y, num_x, K) -> (B*num_patches, K); patch rows are row-major
        # over (num_y, num_x), identical to conv.flatten(2).transpose(1, 2).
        patches2d = patches.reshape(B * self.num_patches, Kdim)
        # TODO(synk): fully fuse the im2col into the Pallas kernel (x kept in
        # HBM via BlockSpec(memory_space=pl.ANY) + double-buffered row-slab
        # make_async_copy) so overlapping pixels are read from HBM only once.

        # --- hot path: tiled Pallas matmul + bias on the MXU ---
        out2d = _patch_embed_matmul(patches2d, self.w_k, self.bias2d,
                                    out_dtype=self.out_dtype)   # (M, E)
        return out2d.reshape(B, self.num_patches, self.embed_dim)


# ---------------------------------------------------------------------------
# Reference (plain JAX conv) for correctness check
# ---------------------------------------------------------------------------
def _reference_forward(x, weight, bias, stride):
    conv = jax.lax.conv_general_dilated(
        x, weight, window_strides=stride, padding="VALID",
        dimension_numbers=("NCHW", "OIHW", "NCHW"))
    conv = conv + bias.reshape(1, -1, 1, 1)
    B, E, Hy, Wx = conv.shape
    return conv.reshape(B, E, Hy * Wx).transpose(0, 2, 1)


if __name__ == "__main__":
    # Small config consistent with the module: overlapping patches
    # (patch 6, stride 5 on a 16x16 image -> 3x3 = 9 patches).
    B, C, H, W = 2, 4, 16, 16
    patch_size, stride_size, embed_dim = 6, 5, 32

    key = jax.random.PRNGKey(0)
    kx, kp = jax.random.split(key)
    x = jax.random.normal(kx, (B, C, H, W), dtype=jnp.float32)

    mod = PatchEmbedOverlap(img_size=(H, W), patch_size=patch_size,
                            stride_size=stride_size, in_chans=C,
                            embed_dim=embed_dim, key=kp)

    out = mod(x)
    out = jax.block_until_ready(out)

    ref = _reference_forward(x, mod.weight, mod.bias,
                             (stride_size, stride_size))
    assert out.shape == (B, mod.num_patches, embed_dim), out.shape
    # bf16 matmul inputs with f32 accumulation: tolerance loosened accordingly.
    assert jnp.allclose(out, ref, atol=2e-2, rtol=2e-2), (
        float(jnp.max(jnp.abs(out - ref))))

    print("KERNEL_OK")
</pallas_src>

<mosaic_0001>
module attributes {stable_mosaic.version = 11 : i64} {
  func.func @_patch_embed_kernel(%arg0: i32, %arg1: memref<18x144xbf16, #tpu.memory_space<vmem>>, %arg2: memref<144x32xbf16, #tpu.memory_space<vmem>>, %arg3: memref<1x32xf32, #tpu.memory_space<vmem>>, %arg4: memref<18x32xf32, #tpu.memory_space<vmem>>) attributes {dimension_semantics = [#tpu.dimension_semantics<parallel>], iteration_bounds = array<i64: 1>, scalar_prefetch = 0 : i64, scratch_operands = 0 : i64, tpu.core_type = #tpu.core_type<tc>, window_params = [{transform_indices = @transform_0, window_bounds = array<i64: 18, 144>}, {pipeline_mode = #tpu.pipeline_mode<synchronous>, transform_indices = @transform_1, window_bounds = array<i64: 144, 32>}, {pipeline_mode = #tpu.pipeline_mode<synchronous>, transform_indices = @transform_2, window_bounds = array<i64: 1, 32>}, {transform_indices = @transform_3, window_bounds = array<i64: 18, 32>}]} {
    %c0 = arith.constant 0 : index
    %c0_0 = arith.constant 0 : index
    %0 = vector.load %arg1[%c0, %c0_0] : memref<18x144xbf16, #tpu.memory_space<vmem>>, vector<18x144xbf16>
    %c0_1 = arith.constant 0 : index
    %c0_2 = arith.constant 0 : index
    %1 = vector.load %arg2[%c0_1, %c0_2] : memref<144x32xbf16, #tpu.memory_space<vmem>>, vector<144x32xbf16>
    %cst = arith.constant dense<0.000000e+00> : vector<18x32xf32>
    %2 = tpu.matmul %0, %1, %cst {dimension_numbers = #tpu.dot_dimension_numbers<[1], [0], [0], [1], [0, 0, 1, 1], [], []>} : vector<18x144xbf16>, vector<144x32xbf16>, vector<18x32xf32> -> vector<18x32xf32>
    %c0_3 = arith.constant 0 : index
    %c0_4 = arith.constant 0 : index
    %3 = vector.load %arg3[%c0_3, %c0_4] : memref<1x32xf32, #tpu.memory_space<vmem>>, vector<1x32xf32>
    %4 = vector.broadcast %3 : vector<1x32xf32> to vector<18x32xf32>
    %5 = arith.addf %2, %4 : vector<18x32xf32>
    %c0_5 = arith.constant 0 : index
    %c0_6 = arith.constant 0 : index
    %6 = vector.load %arg4[%c0_5, %c0_6] : memref<18x32xf32, #tpu.memory_space<vmem>>, vector<18x32xf32>
    tpu.vector_store %arg4[%c0_5, %c0_6], %5 {strides = array<i32>} : memref<18x32xf32, #tpu.memory_space<vmem>>, vector<18x32xf32>,
    return
  }
  func.func @transform_0(%arg0: i32) -> (i32, i32) {
    %c0_i32 = arith.constant 0 : i32
    %c0_i32_0 = arith.constant 0 : i32
    return %arg0, %c0_i32 : i32, i32
  }
  func.func @transform_1(%arg0: i32) -> (i32, i32) {
    %c0_i32 = arith.constant 0 : i32
    %c0_i32_0 = arith.constant 0 : i32
    %c0_i32_1 = arith.constant 0 : i32
    return %c0_i32, %c0_i32_0 : i32, i32
  }
  func.func @transform_2(%arg0: i32) -> (i32, i32) {
    %c0_i32 = arith.constant 0 : i32
    %c0_i32_0 = arith.constant 0 : i32
    %c0_i32_1 = arith.constant 0 : i32
    return %c0_i32, %c0_i32_0 : i32, i32
  }
  func.func @transform_3(%arg0: i32) -> (i32, i32) {
    %c0_i32 = arith.constant 0 : i32
    %c0_i32_0 = arith.constant 0 : i32
    return %arg0, %c0_i32 : i32, i32
  }
}

</mosaic_0001>

<bundles_post_ra>
// kernel: tpu_custom_call.1
= control target key start
LH: loop header
LB: loop body
LE: loop exit
PB: predicated region body
PF: predicated region fallthrough
CT: control target
= control target key end

     0   :  { %v265_v1 = vmov 0   ;;  %vm113_vm0 = vcmask 130048   ;;  %s340_s0 = inlined_call_operand.vmem [shape: bf16[18,144], index: 0, kind: input, shape index: {}]   ;;  %s341_s1 = inlined_call_operand.vmem [shape: bf16[144,32], index: 1, kind: input, shape index: {}]   ;;  %s342_s2 = inlined_call_operand.vmem [shape: f32[1,32], index: 2, kind: input, shape index: {}]   ;;  %s343_s3 = inlined_call_operand.hbm [shape: f32[18,32], index: 3, kind: output, shape index: {}]  }
   0x1   :  { %v227_v0 = vld [vmem:[%s341_s1] sm:$0xff]   ;;  %120 = vmatprep.subr.bf16.mxu0 %v265_v1  ;;  %205 = vmatprep.subr.bf16.mxu1 %v265_v1  ;;  %v228_v2 = vld [vmem:[%s341_s1 + $0x8] sm:$0xff]   ;;  %v229_v3 = vld [vmem:[%s341_s1 + $0x10] sm:$0xff]  }
   0x2   :  { %121 = vmatpush1.bf16.msra.mxu0 %v227_v0  ;;  %214 = vmatpush1.bf16.msra.mxu1 %v227_v0  ;;  %v230_v4 = vld [vmem:[%s341_s1 + $0x18] sm:$0xff]   ;;  %v238_v5 = vld [vmem:[%s340_s0 + $0x4] ss:$8 sps:$4 sm:$0xff]   ;;  %v18_v6 = vld [vmem:[%s340_s0 + $0x10] sm:$0x11] }
   0x3   :  { %122 = vmatprep.subr.bf16.mxu0 %v265_v1  ;;  %206 = vmatprep.subr.bf16.mxu1 %v265_v1  ;;  %v193_v7 = vcombine.high %v18_v6, %v18_v6 }
   0x6   :  { %123 = vmatpush1.bf16.msra.mxu0 %v228_v2  ;;  %215 = vmatpush1.bf16.msra.mxu1 %v228_v2 }
   0x7   :  { %124 = vmatprep.subr.bf16.mxu0 %v265_v1  ;;  %207 = vmatprep.subr.bf16.mxu1 %v265_v1 }
   0xa   :  { %125 = vmatpush1.bf16.msra.mxu0 %v229_v3  ;;  %216 = vmatpush1.bf16.msra.mxu1 %v229_v3 }
   0xb   :  { %126 = vmatprep.subr.bf16.mxu0 %v265_v1  ;;  %208 = vmatprep.subr.bf16.mxu1 %v265_v1 }
   0xc   :  { %8 = vsyncpa [#allocation3], 0  ;;  %203 = vmatprep.mubr.msk.bf16.mxu0 %vm113_vm0, %v238_v5  ;;  %204 = vmatprep.mubr.msk.bf16.mxu1 %vm113_vm0, %v193_v7  ;;  %v231_v8 = vld [vmem:[%s341_s1 + $0x20] sm:$0xff]   ;;  %v232_v9 = vld [vmem:[%s341_s1 + $0x28] sm:$0xff]   ;;  %v192_v14 = vcombine.low %v18_v6, %v18_v6  ;;  %s266_s11 = smov [#allocation2]   ;;  %vm168_vm1 = vcmask 261120  }
   0xd   :  { %v233_v10 = vld [vmem:[%s341_s1 + $0x30] sm:$0xff]   ;;  %v234_v11 = vld [vmem:[%s341_s1 + $0x38] sm:$0xff]   ;;  %v235_v12 = vld [vmem:[%s341_s1 + $0x40] sm:$0xff]   ;;  %s178_s12 = sshll.u32 %s266_s11, 4  ;;  %vm171_vm2 = vcmask 254976   ;;  %s179_s12 = int_to_ptr.vmem [resolvable:$true] %s178_s12 }
   0xe   :  { %127 = vmatpush1.bf16.msra.mxu0 %v230_v4  ;;  %217 = vmatpush1.bf16.msra.mxu1 %v230_v4  ;;  %v236_v13 = vld [vmem:[%s340_s0] ss:$8 sps:$4 sm:$0xff]   ;;  %s241_s0 = scalar_lea.vmem %s179_s12, 384  ;;  %p246_p1 = scmp.lt.s32.totalorder %s179_s12, %s179_s12 }
   0xf   :  { %128 = vmatprep.subr.bf16.mxu0 %v265_v1  ;;  %209 = vmatprep.subr.bf16.mxu1 %v265_v1  ;;  %v189_v15 = vld [vmem:[%s342_s2] ss:$0 sm:$0xff]  ;;  %p242_p0 = scmp.ne.s32.totalorder %s179_s12, %s241_s0  ;;  %p247_p2 = scmp.lt.s32.totalorder %s241_s0, %s241_s0 }
  0x11   :  { %p248_p3 = por %p247_p2, %p246_p1 }
  0x12   :  { %129 = vmatpush1.bf16.msra.mxu0 %v231_v8  ;;  %218 = vmatpush1.bf16.msra.mxu1 %v231_v8 }
  0x13   :  { %130 = vmatprep.subr.bf16.mxu0 %v265_v1  ;;  %210 = vmatprep.subr.bf16.mxu1 %v265_v1  ;;  %p249_p4 = pnand %p248_p3, %p242_p0 }
  0x16   :  { %131 = vmatpush1.bf16.msra.mxu0 %v232_v9  ;;  %219 = vmatpush1.bf16.msra.mxu1 %v232_v9 }
  0x17   :  { %132 = vmatprep.subr.bf16.mxu0 %v265_v1  ;;  %211 = vmatprep.subr.bf16.mxu1 %v265_v1 }
  0x1a   :  { %133 = vmatpush1.bf16.msra.mxu0 %v233_v10  ;;  %220 = vmatpush1.bf16.msra.mxu1 %v233_v10 }
  0x1b   :  { %134 = vmatprep.subr.bf16.mxu0 %v265_v1  ;;  %212 = vmatprep.subr.bf16.mxu1 %v265_v1 }
  0x1e   :  { %135 = vmatpush1.bf16.msra.mxu0 %v234_v11  ;;  %221 = vmatpush1.bf16.msra.mxu1 %v234_v11 }
  0x1f   :  { %136 = vmatprep.subr.bf16.mxu0 %v265_v1  ;;  %213 = vmatprep.subr.bf16.mxu1 %v265_v1 }
  0x22   :  { %137 = vmatpush1.bf16.msra.mxu0 %v235_v12  ;;  %222 = vmatpush1.bf16.msra.mxu1 %v235_v12 }
  0x25   :  { %153 = vmatmul.mubr.bf16.vlgmr.msra.gmra.mrb[0].mxu0 %v236_v13  ;;  %161 = vmatmul.mubr.bf16.vlgmr.msra.gmra.mrb[0].mxu1 %v192_v14 }
  0xf8   :  { %v154_v16 = vpop.f32.mrb[0].mxu0  ;;  %v162_v17 = vpop.f32.mrb[0].mxu1 }
  0xf9   :  { %v155_v18 = vadd.f32 %v189_v15, %v154_v16  ;;  %v163_v19 = vadd.f32 %v189_v15, %v162_v17  ;;  %v156_v20 = vpop.f32.mrb[1].mxu0  ;;  %v164_v21 = vpop.f32.mrb[1].mxu1 }
  0xfa   :  { %v157_v22 = vpop.f32.mrb[2].mxu0  ;;  %v165_v23 = vpop.f32.mrb[2].mxu1 }
  0xfb   :  { %169 = vst.msk [vmem:[#allocation2] sm:$0xff] %vm168_vm1, %v155_v18  ;;  %v158_v24 = vadd.f32 %v189_v15, %v157_v22  ;;  %v159_v25 = vpop.f32.mrb[3].mxu0  ;;  %v166_v26 = vpop.f32.mrb[3].mxu1 }
  0xfc   :  { %172 = vst.msk [vmem:[#allocation2 + $0x10] sm:$0x3] %vm171_vm2, %v163_v19 }
  0xfd   :  { %170 = vst.msk [vmem:[#allocation2 + $0x8] sm:$0xff] %vm168_vm1, %v158_v24 }
  0xfe   :  { %252 = shalt.err (!%p249_p4)
}
  0xff   :  { %s253_s13 = scalar_lea.hbm %s343_s3, 384 }
 0x100   :  { %p254_p5 = scmp.ne.s32.totalorder %s343_s3, %s253_s13  ;;  %p257_p6 = scmp.lt.u32.totalorder %s253_s13, %s343_s3 }
 0x102   :  { %p259_p7 = pnand %p257_p6, %p254_p5 }
 0x104   :  { %262 = shalt.err (!%p259_p7)
}
 0x105   :  { %s267_s18 = smov 128   ;;  %s268_s19 = smov 8  }
 0x106   :  { %184 = dma.vmem_to_hbm [thread:$0]  %s179_s12, 384, %s343_s3, [#allocation3], %s267_s18, %s267_s18, %s268_s19  }
 0x107   :  { %263 = dma.done.wait [#allocation3], 384  }
 0x108   :  { %264 = vsyncadd [#allocation3], 4294966912 }
 0x109   :  { %188 = vsyncpa [#allocation3], 1 }

</bundles_post_ra>
